<compile_context>
chip_gen: v5e
topology: v5e:2x2
jax: 0.10.0
libtpu: 0.0.40
codegen_flags: <defaults>
</compile_context>

<pallas_src>
import jax
import jax.numpy as jnp
from jax.experimental import pallas as pl
from jax.experimental.pallas import tpu as pltpu


def _pos_add_kernel(x_ref, pos_ref, o_ref):
    # x_ref / pos_ref / o_ref: (TB*N, D) -- pure elementwise vreg add.
    o_ref[...] = x_ref[...] + pos_ref[...]


def _choose_tb(B, N, D, itemsize, target_rows, budget_bytes):
    """Pick TB = batch elements per block.

    Largest divisor of B whose (TB*N, D) block (i) fits the per-block byte
    budget, (ii) keeps the sublane (second-last) dim 8-aligned or covers the
    full flattened array, and (iii) stops growing once it reaches the row
    count where the tiled-add HBM-bandwidth plateau is measured (~512+ rows).
    """
    best = 1
    for tb in range(1, B + 1):
        if B % tb:
            continue
        rows = tb * N
        if rows * D * itemsize > budget_bytes:
            break  # blocks only get bigger from here
        if rows % 8 != 0 and rows != B * N:
            continue  # keep the documented (8, 128) sublane alignment
        best = tb
        if rows >= target_rows:
            break
    return best


def positional_encoding(x: jax.Array, pos_emb: jax.Array,
                        *, target_rows: int = 1024,
                        block_budget_bytes: int = 2 << 20) -> jax.Array:
    """x: (B, N, D), pos_emb: (N, D) -> (B, N, D)."""
    B, N, D = x.shape
    assert pos_emb.shape == (N, D)

    # Match dtypes up front: the kernel is 100% memory bound, so an f32 table
    # against bf16 activations would both upcast in-kernel and double the
    # position-table HBM traffic.
    pos_emb = pos_emb.astype(x.dtype)
    itemsize = jnp.dtype(x.dtype).itemsize

    tb = _choose_tb(B, N, D, itemsize, target_rows, block_budget_bytes)
    rows = tb * N                 # rows per block (sublane-aligned)
    num_blocks = B // tb          # grid extent

    x2 = x.reshape(B * N, D)
    # One block's worth of position table (tiny, built once outside the
    # kernel); constant index_map below keeps it resident in VMEM.
    pos_block = jnp.tile(pos_emb, (tb, 1)) if tb > 1 else pos_emb

    out = pl.pallas_call(
        _pos_add_kernel,
        out_shape=jax.ShapeDtypeStruct((B * N, D), x.dtype),
        grid=(num_blocks,),
        in_specs=[
            pl.BlockSpec((rows, D), lambda i: (i, 0)),   # stream x rows
            pl.BlockSpec((rows, D), lambda i: (0, 0)),   # resident pos block
        ],
        out_specs=pl.BlockSpec((rows, D), lambda i: (i, 0)),
        compiler_params=pltpu.CompilerParams(
            dimension_semantics=("parallel",),
        ),
    )(x2, pos_block)
    return out.reshape(B, N, D)


if __name__ == "__main__":
    # Small demo shapes consistent with the module. embedding_dim=128 keeps
    # the lane axis dense (unmasked 128-wide stores) while staying tiny.
    B, num_patches, embedding_dim = 2, 8, 128

    key = jax.random.PRNGKey(0)
    k_x, k_emb = jax.random.split(key)

    # nn.Embedding weights ~ N(0, 1); positions = arange(num_patches), so the
    # looked-up table is the weight matrix itself (identity gather done here
    # in the wrapper, outside the memory-bound add kernel).
    emb_weight = jax.random.normal(
        k_emb, (num_patches, embedding_dim), dtype=jnp.float32
    )
    positions = jnp.arange(num_patches)
    pos_embedding = jnp.take(emb_weight, positions, axis=0)

    x = jax.random.normal(k_x, (B, num_patches, embedding_dim), dtype=jnp.float32)

    out = positional_encoding(x, pos_embedding)
    out = jax.block_until_ready(out)

    # Reference check against plain JAX broadcast add.
    ref = x + pos_embedding[None, :, :]
    assert out.shape == (B, num_patches, embedding_dim)
    assert jnp.allclose(out, ref, atol=1e-6), "mismatch vs reference"

    print("KERNEL_OK")
</pallas_src>

<mosaic_0001>
module attributes {stable_mosaic.version = 11 : i64} {
  func.func @_pos_add_kernel(%arg0: i32, %arg1: memref<16x128xf32, #tpu.memory_space<vmem>>, %arg2: memref<16x128xf32, #tpu.memory_space<vmem>>, %arg3: memref<16x128xf32, #tpu.memory_space<vmem>>) attributes {dimension_semantics = [#tpu.dimension_semantics<parallel>], iteration_bounds = array<i64: 1>, scalar_prefetch = 0 : i64, scratch_operands = 0 : i64, tpu.core_type = #tpu.core_type<tc>, window_params = [{transform_indices = @transform_0, window_bounds = array<i64: 16, 128>}, {pipeline_mode = #tpu.pipeline_mode<synchronous>, transform_indices = @transform_1, window_bounds = array<i64: 16, 128>}, {transform_indices = @transform_2, window_bounds = array<i64: 16, 128>}]} {
    %c0 = arith.constant 0 : index
    %c0_0 = arith.constant 0 : index
    %0 = vector.load %arg1[%c0, %c0_0] : memref<16x128xf32, #tpu.memory_space<vmem>>, vector<16x128xf32>
    %c0_1 = arith.constant 0 : index
    %c0_2 = arith.constant 0 : index
    %1 = vector.load %arg2[%c0_1, %c0_2] : memref<16x128xf32, #tpu.memory_space<vmem>>, vector<16x128xf32>
    %2 = arith.addf %0, %1 : vector<16x128xf32>
    %c0_3 = arith.constant 0 : index
    %c0_4 = arith.constant 0 : index
    %3 = vector.load %arg3[%c0_3, %c0_4] : memref<16x128xf32, #tpu.memory_space<vmem>>, vector<16x128xf32>
    tpu.vector_store %arg3[%c0_3, %c0_4], %2 {strides = array<i32>} : memref<16x128xf32, #tpu.memory_space<vmem>>, vector<16x128xf32>,
    return
  }
  func.func @transform_0(%arg0: i32) -> (i32, i32) {
    %c0_i32 = arith.constant 0 : i32
    %c0_i32_0 = arith.constant 0 : i32
    return %arg0, %c0_i32 : i32, i32
  }
  func.func @transform_1(%arg0: i32) -> (i32, i32) {
    %c0_i32 = arith.constant 0 : i32
    %c0_i32_0 = arith.constant 0 : i32
    %c0_i32_1 = arith.constant 0 : i32
    return %c0_i32, %c0_i32_0 : i32, i32
  }
  func.func @transform_2(%arg0: i32) -> (i32, i32) {
    %c0_i32 = arith.constant 0 : i32
    %c0_i32_0 = arith.constant 0 : i32
    return %arg0, %c0_i32 : i32, i32
  }
}

</mosaic_0001>

<bundles_post_ra>
// kernel: tpu_custom_call.1
= control target key start
LH: loop header
LB: loop body
LE: loop exit
PB: predicated region body
PF: predicated region fallthrough
CT: control target
= control target key end

     0   :  { %7 = vsyncpa [#allocation3], 0  ;;  %s184_s0 = inlined_call_operand.hbm [shape: f32[16,128], index: 0, kind: input, shape index: {}]   ;;  %s185_s1 = inlined_call_operand.hbm [shape: f32[16,128], index: 1, kind: input, shape index: {}]   ;;  %s186_s2 = inlined_call_operand.hbm [shape: f32[16,128], index: 2, kind: output, shape index: {}]  }
   0x1   :  { %8 = vsyncpa [#allocation6], 0 }
   0x2   :  { %9 = vsyncpa [#allocation4], 0  ;;  %s14_s11 = sshll.u32 %s184_s0, 4  ;;  %s155_s12 = smov [#allocation2]   ;;  %s15_s11 = int_to_ptr.hbm [resolvable:$true] %s14_s11 }
   0x3   :  { %s16_s13 = sshll.u32 %s155_s12, 4  ;;  %s27_s16 = sshll.u32 %s185_s1, 4  ;;  %s17_s13 = int_to_ptr.vmem [resolvable:$true] %s16_s13  ;;  %s28_s16 = int_to_ptr.hbm [resolvable:$true] %s27_s16 }
   0x4   :  { %s156_s17 = smov 128   ;;  %s157_s18 = smov 8  }
   0x5   :  { %22 = dma.hbm_to_vmem [thread:$0]  %s15_s11, 256, %s17_s13, [#allocation3], %s156_s17, %s156_s17, %s157_s18  }
   0x6   :  { %s158_s19 = smov [#allocation5]  }
   0x7   :  { %s29_s20 = sshll.u32 %s158_s19, 4  ;;  %s30_s20 = int_to_ptr.vmem [resolvable:$true] %s29_s20 }
   0x8   :  { %35 = dma.hbm_to_vmem [thread:$0]  %s28_s16, 256, %s30_s20, [#allocation6], %s156_s17, %s156_s17, %s157_s18  }
   0x9   :  { %149 = dma.done.wait [#allocation3], 256  }
   0xa   :  { %150 = vsyncadd [#allocation3], 4294967040 }
   0xb   :  { %151 = dma.done.wait [#allocation6], 256  }
   0xc   :  { %152 = vsyncadd [#allocation6], 4294967040  ;;  %s159_s0 = smov [#allocation7]   ;;  %s58_s24 = sshll.u32 %s186_s2, 4  ;;  %v44_v0 = vld [vmem:[#allocation2] sm:$0xff]  ;;  %v46_v1 = vld [vmem:[#allocation5] sm:$0xff]  ;;  %s59_s24 = int_to_ptr.hbm [resolvable:$true] %s58_s24 }
   0xd   :  { %s56_s21 = sshll.u32 %s159_s0, 4  ;;  %v45_v2 = vld [vmem:[#allocation2 + $0x8] sm:$0xff]  ;;  %v48_v3 = vadd.f32 %v46_v1, %v44_v0  ;;  %v47_v4 = vld [vmem:[#allocation5 + $0x8] sm:$0xff]  ;;  %s57_s21 = int_to_ptr.vmem [resolvable:$true] %s56_s21 }
   0xe   :  { %v49_v5 = vadd.f32 %v47_v4, %v45_v2 }
   0xf   :  { %50 = vst [vmem:[#allocation7] sm:$0xff] %v48_v3 }
  0x10   :  { %51 = vst [vmem:[#allocation7 + $0x8] sm:$0xff] %v49_v5 }
  0x11   :  { %64 = dma.vmem_to_hbm [thread:$0]  %s57_s21, 256, %s59_s24, [#allocation4], %s156_s17, %s156_s17, %s157_s18  }
  0x12   :  { %153 = dma.done.wait [#allocation4], 256  }
  0x13   :  { %154 = vsyncadd [#allocation4], 4294967040 }
  0x14   :  { %69 = vsyncpa [#allocation3], 1 }
  0x15   :  { %70 = vsyncpa [#allocation6], 1 }
  0x16   :  { %71 = vsyncpa [#allocation4], 1 }

</bundles_post_ra>
